<compile_context>
chip_gen: v7x
topology: tpu7x:2x2x1
jax: 0.10.0
libtpu: 0.0.40
codegen_flags: <defaults>
</compile_context>

<pallas_src>
import jax
import jax.numpy as jnp
from jax import lax
from jax.experimental import pallas as pl
from jax.experimental.pallas import tpu as pltpu


# ---------------------------------------------------------------------------
# VMEM / tiling helpers (generation-aware, padded-tile accounting)
# ---------------------------------------------------------------------------
def _vmem_capacity_bytes():
    """Physical per-core VMEM (v5e/v6e: 128 MiB, v7x: 64 MiB); conservative fallback."""
    try:
        cap = int(getattr(pltpu.get_tpu_info(), "vmem_capacity_bytes", 0))
        if cap > 0:
            return cap
    except Exception:
        pass
    return 64 * 1024 * 1024


def _round_up(x, m):
    return -(-x // m) * m


def _sublane_multiple(itemsize):
    # native sublane tile height per element width (f32: 8, bf16: 16, int8/fp8: 32)
    return {4: 8, 2: 16, 1: 32}.get(int(itemsize), 8)


def _padded_tile_bytes(rows, cols, itemsize):
    """VMEM footprint of a (1, rows, cols) block after (sublane, 128) padding."""
    return _round_up(rows, _sublane_multiple(itemsize)) * _round_up(cols, 128) * itemsize


def _row_block_candidates(c, itemsize):
    """Valid second-to-last block sizes: divisors of C that are sublane multiples, or full C."""
    sub = _sublane_multiple(itemsize)
    cands = {c}
    d = sub
    while d < c:
        if c % d == 0:
            cands.add(d)
        d += sub
    return sorted(cands, reverse=True)


def _lane_block_candidates(tv):
    """Valid last block sizes: divisors of TV that are multiples of 128, or full TV."""
    cands = {tv}
    d = 128
    while d < tv:
        if tv % d == 0:
            cands.add(d)
        d += 128
    return sorted(cands, reverse=True)


def _choose_blocks(n, c, tv, itemsize, *, footprint_fn, budget, min_steps=8):
    cbs = _row_block_candidates(c, itemsize)
    tvbs = _lane_block_candidates(tv)
    # Largest block whose *padded* pipelined footprint fits the budget; prefer
    # keeping the lane (TV) extent long so HBM DMAs stay contiguous/unmasked.
    ci, ti = len(cbs) - 1, len(tvbs) - 1          # smallest valid fallback
    done = False
    for t_idx, tvb in enumerate(tvbs):
        for c_idx, cb in enumerate(cbs):
            if footprint_fn(cb, tvb) <= budget:
                ci, ti = c_idx, t_idx
                done = True
                break
        if done:
            break
    # Guarantee enough grid steps for double-buffering and >= 2 blocks on a
    # parallel axis (so both v7x TensorCores get work), when the shape allows.
    while n * (c // cbs[ci]) * (tv // tvbs[ti]) < min_steps:
        if ci + 1 < len(cbs):
            ci += 1                                # split C first: DMA rows stay long
        elif ti + 1 < len(tvbs):
            ti += 1
        else:
            break
    return cbs[ci], tvbs[ti]


# ---------------------------------------------------------------------------
# Pallas kernel: out[n, c, tv] = x[n, c, tv] * factor[n, 0, tv]   (lane-dense)
# ---------------------------------------------------------------------------
def _apply_mask_kernel(x_ref, f_ref, o_ref):
    # x_ref/o_ref: (1, cb, tvb) in x.dtype; f_ref: (1, 1, tvb) float32.
    # Multiply in f32 (free on a mem-bound kernel, avoids double rounding for
    # low-precision x) and cast exactly once on the store.
    o_ref[...] = (x_ref[...].astype(jnp.float32) * f_ref[...]).astype(o_ref.dtype)


def _apply_temporal_mask(x_flat, factor_flat, *, donate_x=False, min_steps=8):
    """x_flat: (N, C, T*V) any float dtype; factor_flat: (N, 1, T*V) float32."""
    n, c, tv = x_flat.shape
    itemsize = x_flat.dtype.itemsize
    vmem_cap = _vmem_capacity_bytes()

    def footprint(cb, tvb):
        x_tile = _padded_tile_bytes(cb, tvb, itemsize)   # one x / out tile
        f32_tile = _padded_tile_bytes(cb, tvb, 4)        # one full-tile f32 temp
        f_tile = _padded_tile_bytes(1, tvb, 4)           # one factor tile
        # 2x input + 2x output double buffers, ~3 full-tile f32 intermediates
        # in the kernel body (upcast, product, downcast), 2x factor buffers.
        return 4 * x_tile + 3 * f32_tile + 2 * f_tile

    cb, tvb = _choose_blocks(
        n, c, tv, itemsize,
        footprint_fn=footprint,
        budget=int(vmem_cap * 0.6),     # leave headroom under physical VMEM
        min_steps=min_steps)
    grid = (n, c // cb, tv // tvb)

    cost = pl.CostEstimate(
        flops=int(x_flat.size),
        transcendentals=0,
        bytes_accessed=int(2 * x_flat.size * itemsize
                           + (c // cb) * factor_flat.size * factor_flat.dtype.itemsize))

    return pl.pallas_call(
        _apply_mask_kernel,
        out_shape=jax.ShapeDtypeStruct((n, c, tv), x_flat.dtype),
        grid=grid,
        in_specs=[
            pl.BlockSpec((1, cb, tvb), lambda ni, ci, ti: (ni, ci, ti)),
            pl.BlockSpec((1, 1, tvb), lambda ni, ci, ti: (ni, 0, ti)),
        ],
        out_specs=pl.BlockSpec((1, cb, tvb), lambda ni, ci, ti: (ni, ci, ti)),
        compiler_params=pltpu.CompilerParams(
            dimension_semantics=("parallel", "parallel", "parallel"),
            vmem_limit_bytes=int(vmem_cap * 3 // 4)),
        cost_estimate=cost,
        input_output_aliases=({0: 0} if donate_x else {}),
    )(x_flat, factor_flat)


# ---------------------------------------------------------------------------
# Per-(n, t) drop statistics: abs-mean, Bernoulli draw, 1-D max-pool (tiny, jnp)
# ---------------------------------------------------------------------------
def _temporal_drop_factor(x, keep_prob, key, block_size):
    """Return the per-(n,t) multiplicative factor mask*numel/sum, float32 (N, T)."""
    n, c, t, v = x.shape
    # NOTE(per review): this full-x reduction is left to XLA (runs at roofline
    # and can fuse into the producer of x); Pallas handles only the apply pass.
    input_abs = jnp.mean(jnp.mean(jnp.abs(x), axis=3), axis=1).astype(jnp.float32)
    input_abs = input_abs / jnp.sum(input_abs) * float(n * t)
    gamma = (1.0 - keep_prob) / block_size
    p = jnp.minimum(input_abs * gamma, 1.0)
    m = jax.random.bernoulli(key, p).astype(jnp.float32)               # (N, T)
    # max_pool1d over time: kernel=block_size, stride=1, pad=block_size//2
    pad = block_size // 2
    m_sum = lax.reduce_window(m, -jnp.inf, lax.max,
                              window_dimensions=(1, block_size),
                              window_strides=(1, 1),
                              padding=[(0, 0), (pad, pad)])
    mask = 1.0 - m_sum                                                 # (N, T)
    # scale = mask.numel()/mask.sum() with the torch mask shaped (n, c*v, t)
    mask_numel = float(n * c * v * t)
    mask_sum = float(c * v) * jnp.sum(mask)
    # Deliberate deviation from torch: clamp the (vanishingly unlikely)
    # all-dropped case so the output is 0s instead of inf/nan.
    mask_sum = jnp.maximum(mask_sum, jnp.float32(1e-6))
    return mask * (mask_numel / mask_sum)


# ---------------------------------------------------------------------------
# DropGraphTemporal.forward
# ---------------------------------------------------------------------------
def drop_graph_temporal(x, keep_prob, key=None, *, block_size=7, training=True,
                        donate_x=False, min_steps=8):
    """DropGraphTemporal.forward.  x: (N, C, T, V), any float dtype."""
    if not training:
        return x
    # Static shortcut for concrete keep_prob == 1; a traced keep_prob == 1
    # still yields exactly x through the drop path (gamma == 0 -> mask == 1).
    if isinstance(keep_prob, (int, float)) and float(keep_prob) == 1.0:
        return x
    if key is None:
        raise ValueError("a PRNG key is required on the dropout path")

    n, c, t, v = x.shape
    factor_nt = _temporal_drop_factor(x, keep_prob, key, block_size)   # (N, T) f32
    # Expand per-(n,t) factor to the flattened (t,v) lane axis once (tiny).
    factor_flat = jnp.broadcast_to(factor_nt[:, :, None], (n, t, v)).reshape(n, 1, t * v)

    # Lane-dense Pallas apply pass on the contiguous (N, C, T*V) view.
    out_flat = _apply_temporal_mask(x.reshape(n, c, t * v), factor_flat,
                                    donate_x=donate_x, min_steps=min_steps)
    return out_flat.reshape(n, c, t, v)


# ---------------------------------------------------------------------------
# Pure-JAX reference (mirrors the PyTorch forward).  It shares the factor
# computation so the Bernoulli draw is bit-identical; the broadcast multiply
# (the part the Pallas kernel implements) is done independently by XLA here.
# ---------------------------------------------------------------------------
def drop_graph_temporal_ref(x, keep_prob, key, *, block_size=7):
    factor_nt = _temporal_drop_factor(x, keep_prob, key, block_size)   # (N, T) f32
    return x * factor_nt[:, None, :, None]


# ---------------------------------------------------------------------------
if __name__ == "__main__":
    # DropGraphTemporal has no learned parameters (block_size only).
    keep_prob = 0.9
    block_size = 7

    key = jax.random.PRNGKey(0)
    kx, kd, kx2, kd2, kx3, kd3, kx4, kd4 = jax.random.split(key, 8)

    # 1) Small shape consistent with the module: N=2, C=4, T=16, V=16.
    N, C, T, V = 2, 4, 16, 16
    x = jax.random.normal(kx, (N, C, T, V), dtype=jnp.float32)
    out = jax.block_until_ready(
        drop_graph_temporal(x, keep_prob, kd, block_size=block_size, training=True))
    assert out.shape == x.shape and out.dtype == x.dtype
    assert bool(jnp.all(jnp.isfinite(out)))
    ref = jax.block_until_ready(
        drop_graph_temporal_ref(x, keep_prob, kd, block_size=block_size))
    assert bool(jnp.allclose(out, ref, rtol=1e-5, atol=1e-5))

    # 2) Multi-block grid (C and TV both split; exercises the min-steps logic).
    x2 = jax.random.normal(kx2, (2, 16, 24, 16), dtype=jnp.float32)
    out2 = jax.block_until_ready(
        drop_graph_temporal(x2, keep_prob, kd2, block_size=block_size, training=True))
    ref2 = drop_graph_temporal_ref(x2, keep_prob, kd2, block_size=block_size)
    assert bool(jnp.allclose(out2, ref2, rtol=1e-5, atol=1e-5))

    # 3) Low-precision x (bf16): multiply in f32 inside the kernel, cast on store.
    x3 = jax.random.normal(kx3, (2, 16, 24, 16), dtype=jnp.float32).astype(jnp.bfloat16)
    out3 = jax.block_until_ready(
        drop_graph_temporal(x3, keep_prob, kd3, block_size=block_size, training=True))
    assert out3.dtype == jnp.bfloat16
    ref3 = drop_graph_temporal_ref(x3, keep_prob, kd3, block_size=block_size)
    assert bool(jnp.allclose(out3.astype(jnp.float32), ref3.astype(jnp.float32),
                             rtol=1e-2, atol=1e-2))

    # 4) Inference-like N=1 batch with x donated to the output (aliased).
    x4 = jax.random.normal(kx4, (1, 16, 24, 16), dtype=jnp.float32)
    ref4 = jax.block_until_ready(
        drop_graph_temporal_ref(x4, keep_prob, kd4, block_size=block_size))
    out4 = jax.block_until_ready(
        drop_graph_temporal(x4, keep_prob, kd4, block_size=block_size, training=True,
                            donate_x=True))
    assert bool(jnp.allclose(out4, ref4, rtol=1e-5, atol=1e-5))

    # 5) eval / keep_prob == 1 fast paths return x unchanged.
    assert bool(jnp.all(drop_graph_temporal(x, keep_prob, kd, training=False) == x))
    assert bool(jnp.all(drop_graph_temporal(x, 1.0, kd, training=True) == x))

    print("KERNEL_OK")
</pallas_src>

<mosaic_0001>
module attributes {stable_mosaic.version = 11 : i64} {
  func.func @_apply_mask_kernel(%arg0: i32, %arg1: i32, %arg2: i32, %arg3: memref<1x4x128xf32, #tpu.memory_space<vmem>>, %arg4: memref<1x1x128xf32, #tpu.memory_space<vmem>>, %arg5: memref<1x4x128xf32, #tpu.memory_space<vmem>>) attributes {dimension_semantics = [#tpu.dimension_semantics<parallel>, #tpu.dimension_semantics<parallel>, #tpu.dimension_semantics<parallel>], iteration_bounds = array<i64: 2, 1, 2>, scalar_prefetch = 0 : i64, scratch_operands = 0 : i64, tpu.core_type = #tpu.core_type<tc>, window_params = [{transform_indices = @transform_0, window_bounds = array<i64: 1, 4, 128>}, {transform_indices = @transform_1, window_bounds = array<i64: 1, 1, 128>}, {transform_indices = @transform_2, window_bounds = array<i64: 1, 4, 128>}]} {
    %c0 = arith.constant 0 : index
    %c0_0 = arith.constant 0 : index
    %c0_1 = arith.constant 0 : index
    %0 = vector.load %arg3[%c0, %c0_0, %c0_1] : memref<1x4x128xf32, #tpu.memory_space<vmem>>, vector<1x4x128xf32>
    %c0_2 = arith.constant 0 : index
    %c0_3 = arith.constant 0 : index
    %c0_4 = arith.constant 0 : index
    %1 = vector.load %arg4[%c0_2, %c0_3, %c0_4] : memref<1x1x128xf32, #tpu.memory_space<vmem>>, vector<1x1x128xf32>
    %2 = vector.broadcast %1 : vector<1x1x128xf32> to vector<1x4x128xf32>
    %3 = arith.mulf %0, %2 : vector<1x4x128xf32>
    %c0_5 = arith.constant 0 : index
    %c0_6 = arith.constant 0 : index
    %c0_7 = arith.constant 0 : index
    %4 = vector.load %arg5[%c0_5, %c0_6, %c0_7] : memref<1x4x128xf32, #tpu.memory_space<vmem>>, vector<1x4x128xf32>
    tpu.vector_store %arg5[%c0_5, %c0_6, %c0_7], %3 {strides = array<i32>} : memref<1x4x128xf32, #tpu.memory_space<vmem>>, vector<1x4x128xf32>,
    return
  }
  func.func @transform_0(%arg0: i32, %arg1: i32, %arg2: i32) -> (i32, i32, i32) {
    %c0_i32 = arith.constant 0 : i32
    return %arg0, %arg1, %arg2 : i32, i32, i32
  }
  func.func @transform_1(%arg0: i32, %arg1: i32, %arg2: i32) -> (i32, i32, i32) {
    %c0_i32 = arith.constant 0 : i32
    %c0_i32_0 = arith.constant 0 : i32
    return %arg0, %c0_i32, %arg2 : i32, i32, i32
  }
  func.func @transform_2(%arg0: i32, %arg1: i32, %arg2: i32) -> (i32, i32, i32) {
    %c0_i32 = arith.constant 0 : i32
    return %arg0, %arg1, %arg2 : i32, i32, i32
  }
}

</mosaic_0001>

<bundles_post_ra>
// kernel: tpu_custom_call.1
= control target key start
LH: loop header
LB: loop body
LE: loop exit
PB: predicated region body
PF: predicated region fallthrough
CT: control target
= control target key end

     0   :  { %7 = vsyncpa [#allocation3], 0  ;;  %s893_s0 = inlined_call_operand.hbm [shape: f32[2,4,256], index: 0, kind: input, shape index: {}]   ;;  %s894_s1 = inlined_call_operand.hbm [shape: f32[2,1,256], index: 1, kind: input, shape index: {}]   ;;  %s895_s2 = inlined_call_operand.hbm [shape: f32[2,4,256], index: 2, kind: output, shape index: {}]  }
   0x1   :  { %9 = vsyncpa [#allocation3 + $0x1], 0 }
   0x2   :  { %10 = vsyncpa [#allocation6], 0 }
   0x3   :  { %12 = vsyncpa [#allocation6 + $0x1], 0 }
   0x4   :  { %13 = vsyncpa [#allocation4], 0 }
   0x5   :  { %15 = vsyncpa [#allocation4 + $0x1], 0  ;;  %s653_s9 = smov 0   ;;  %s655_s10 = smov 0  }
   0x6   :  { %s657_s11 = smov 0   ;;  %s659_s12 = smov 0  }
   0x7   :  { %s661_s13 = smov 0   ;;  %s663_s14 = smov 0  }
   0x8   :  { %s665_s15 = smov 0   ;;  %s667_s16 = smov 0  }
   0x9 LB: > { %s370_s17 = sadd.s32 4294967295, %s633_s16   ;;  %s371_s18 = sadd.s32 4294967294, %s633_s16   ;;  %s633_s16 = sphi %s667_s16, %s21_s16   ;;  %s629_s15 = sphi %s665_s15, %s916_s15   ;;  %s625_s14 = sphi %s663_s14, %s915_s14   ;;  %s621_s13 = sphi %s661_s13, %s914_s13   ;;  %s617_s12 = sphi %s659_s12, %s913_s12   ;;  %s613_s11 = sphi %s657_s11, %s912_s11   ;;  %s609_s10 = sphi %s655_s10, %s911_s10   ;;  %s605_s9 = sphi %s653_s9, %s910_s9  }
   0xa   : > { %s33_s19 = sadd.s32 1, %s625_s14  ;;  %s40_s20 = sadd.s32 1, %s629_s15 }
   0xb   : > { %p34_p0 = scmp.ge.s32.totalorder %s33_s19, 2  ;;  %s51_s21 = sadd.s32 1, %s613_s11 }
   0xc   : > { %p58_p1 = scmp.ne.s32.totalorder %s613_s11, %s609_s10  ;;  %p59_p2 = scmp.eq.s32.totalorder %s633_s16, 0 }
   0xd   : > { %s918_s19 = smov (%p34_p0, %s33_s19), 0  ;;  %s920_s20 = smov (!%p34_p0, %s40_s20), %s629_s15 }
   0xe   : > { %s47_s22 = ssub.s32 %s625_s14, %s918_s19  ;;  %p706_p3 = por %p59_p2, %p58_p1 }
   0xf   : > { %p42_p4 = scmp.ge.s32.totalorder %s920_s20, 2  ;;  %p64_p5 = scmp.ne.s32.totalorder %s609_s10, %s605_s9 }
  0x10   : > { %p65_p6 = scmp.eq.s32.totalorder %s370_s17, 0  ;;  %p120_p7 = scmp.eq.s32.totalorder %s370_s17, 3 }
  0x11   : > { %s922_s20 = smov (%p42_p4, %s920_s20), 0  ;;  %p126_p10 = scmp.eq.s32.totalorder %s371_s18, 3 }
  0x12   : > { %p714_p8 = por %p65_p6, %p64_p5  ;;  %p718_p9 = por %p120_p7, %p58_p1 }
  0x13   : > { %s44_s26 = ssub.s32 %s629_s15, %s922_s20  ;;  %p724_p12 = por %p126_p10, %p64_p5 }
  0x14   : > { %s899_s24 = scalar_select %p714_p8, 1, 0 }
  0x15   : > { %s900_s25 = scalar_select %p718_p9, 1, 0 }
  0x16   : > { %s48_s27 = sor.u32 %s47_s22, %s44_s26  ;;  %p405_p13 = scmp.lt.s32.totalorder %s633_s16, 4 }
  0x17   : > { %p49_p11 = scmp.eq.s32.totalorder %s48_s27, 0  ;;  %s730_s29 = sand.u32 1, %s613_s11  }
  0x18   : > { %s901_s28 = scalar_select %p724_p12, 1, 0 }
  0x19   : > { %s733_s30 = scalar_select %p49_p11, %s613_s11, %s51_s21  }
  0x1a   : > { %s374_s3 = sshll.u32 %s730_s29, 2  ;;  %s375_s4 = sshll.u32 %s629_s15, 1 }
  0x1b   : > { %s738_s5 = sadd.s32 %s625_s14, %s375_s4  ;;  %s150_s6 = scalar_lea.vmem [#allocation2], %s374_s3 }
  0x1c   : > { %s161_s7 = sshll.u32 %s150_s6, 4  ;;  %s376_s8 = sshll.u32 %s738_s5, 6  ;;  %s741_s7 = int_to_ptr.vmem [resolvable:$true] %s161_s7 }
  0x1d   : > { %s746_s22 = scalar_lea.hbm %s893_s0, %s376_s8  ;;  %p750_p0 = pnand %p405_p13, %p706_p3 }
  0x1e   : > { %s147_s26 = scalar_lea.sflag [#allocation3], %s730_s29  ;;  %s471_s27 = scalar_lea.hbm %s746_s22, 64 }
  0x1f   : > { %p472_p4 = scmp.ne.s32.totalorder %s746_s22, %s471_s27  ;;  %p473_p5 = pneg %p750_p0 }
  0x20   : > { %s476_s4 = scalar_lea.hbm %s893_s0, 256  ;;  %p477_p3 = scmp.lt.u32.totalorder %s746_s22, %s893_s0 }
  0x21   : > { %p474_p6 = pnand %p473_p5, %p472_p4  ;;  %p478_p10 = scmp.lt.u32.totalorder %s476_s4, %s471_s27 }
  0x22   : > { %p480_p13 = scmp.lt.u32.totalorder %s471_s27, %s746_s22 }
  0x23   : > { %p475_p7 = pneg %p474_p6  ;;  %p479_p11 = por %p478_p10, %p477_p3 }
  0x25   : > { %p481_p1 = por %p480_p13, %p479_p11 }
  0x27   : > { %p482_p2 = pnand %p481_p1, %p475_p7 }
  0x29   : > { %485 = shalt.err (!%p482_p2)
}
  0x2a   : > { %s486_s17 = scalar_lea.vmem %s741_s7, 64  ;;  %s635_s18 = smov [#allocation2]  }
  0x2b   : > { %p487_p4 = scmp.ne.s32.totalorder %s741_s7, %s486_s17  ;;  %s491_s23 = sshll.u32 %s635_s18, 4  ;;  %s492_s23 = int_to_ptr.vmem [resolvable:$false] %s491_s23 }
  0x2c   : > { %s493_s3 = scalar_lea.vmem %s492_s23, 128  ;;  %p494_p9 = scmp.lt.s32.totalorder %s741_s7, %s492_s23 }
  0x2d   : > { %p489_p6 = pnand %p487_p4, %p473_p5  ;;  %p495_p3 = scmp.lt.s32.totalorder %s493_s3, %s486_s17 }
  0x2f   : > { %p490_p12 = pneg %p489_p6  ;;  %p496_p10 = por %p495_p3, %p494_p9 }
  0x31   : > { %p497_p11 = pnand %p496_p10, %p490_p12 }
  0x33   : > { %500 = shalt.err (!%p497_p11)
}
  0x34   : > { %397 = dma.hbm_to_vmem [thread:$0]  (!%p750_p0), %s746_s22, 64, %s741_s7, %s147_s26  }
  0x35   : > { %p903_p1 = scmp.lt.s32.totalorder %s633_s16, 5  ;;  %p904_p2 = scmp.ge.s32.totalorder %s633_s16, 1 }
  0x36   : > { %s378_s4 = sshll.u32 %s738_s5, 4  ;;  %s171_s6 = scalar_lea.vmem [#allocation5], %s730_s29 }
  0x37   : > { %p786_p7 = pnand %p904_p2, %p903_p1  ;;  %s180_s8 = sshll.u32 %s171_s6, 4  ;;  %s181_s8 = int_to_ptr.vmem [resolvable:$true] %s180_s8 }
  0x38   : > { %s795_s23 = scalar_lea.hbm %s894_s1, %s378_s4  ;;  %s169_s7 = scalar_lea.sflag [#allocation6], %s730_s29 }
  0x39   : > { %s905_s27 = scalar_select %p786_p7, 1, 0 }
  0x3a   : > { %s501_s22 = scalar_lea.hbm %s795_s23, 16  ;;  %s506_s3 = scalar_lea.hbm %s894_s1, 64 }
  0x3b   : > { %p502_p9 = scmp.ne.s32.totalorder %s795_s23, %s501_s22  ;;  %p507_p4 = scmp.lt.u32.totalorder %s795_s23, %s894_s1 }
  0x3c   : > { %p508_p6 = scmp.lt.u32.totalorder %s506_s3, %s501_s22  ;;  %p510_p10 = scmp.lt.u32.totalorder %s501_s22, %s795_s23 }
  0x3d   : > { %p504_p12 = pnand %p502_p9, %p473_p5 }
  0x3e   : > { %p509_p3 = por %p508_p6, %p507_p4 }
  0x3f   : > { %p505_p13 = pneg %p504_p12 }
  0x40   : > { %p511_p11 = por %p510_p10, %p509_p3 }
  0x42   : > { %p512_p1 = pnand %p511_p11, %p505_p13 }
  0x44   : > { %515 = shalt.err (!%p512_p1)
}
  0x45   : > { %s516_s29 = scalar_lea.vmem %s181_s8, 16  ;;  %s636_s4 = smov [#allocation5]  }
  0x46   : > { %p517_p2 = scmp.ne.s32.totalorder %s181_s8, %s516_s29  ;;  %s521_s18 = sshll.u32 %s636_s4, 4  ;;  %s522_s18 = int_to_ptr.vmem [resolvable:$false] %s521_s18 }
  0x47   : > { %s523_s5 = scalar_lea.vmem %s522_s18, 32  ;;  %p524_p8 = scmp.lt.s32.totalorder %s181_s8, %s522_s18 }
  0x48   : > { %p519_p9 = pnand %p517_p2, %p473_p5  ;;  %p525_p7 = scmp.lt.s32.totalorder %s523_s5, %s516_s29 }
  0x4a   : > { %p520_p12 = pneg %p519_p9  ;;  %p526_p4 = por %p525_p7, %p524_p8 }
  0x4c   : > { %p527_p6 = pnand %p526_p4, %p520_p12 }
  0x4e   : > { %530 = shalt.err (!%p527_p6)
}
  0x4f   : > { %400 = dma.hbm_to_vmem [thread:$0]  (!%p750_p0), %s795_s23, 16, %s181_s8, %s169_s7  }
  0x50   : > { %p906_p13 = scmp.ne.s32.totalorder %s905_s27, 0 }
  0x51   : > { %s820_s22 = sand.u32 (!%p906_p13), 1, %s609_s10   ;;  %p907_p5 = scmp.ne.s32.totalorder (!%p906_p13), %s899_s24, 0 }
  0x52   : > { %189 = sbr.rel (%p906_p13) target bundleno = 119 (0x77), region = 28  ;;  %s380_s26 = sshll.u32 (!%p906_p13), %s820_s22, 2 }
  0x53   : > { %s192_s3 = scalar_lea.sflag (!%p906_p13), [#allocation3], %s820_s22  ;;  %s195_s6 = scalar_lea.vmem (!%p906_p13), [#allocation2], %s380_s26 }
  0x59   : > { %592 = dma.done.wait (%p907_p5), %s192_s3, 64  }
  0x5a   : > { %594 = vsyncadd (%p907_p5), %s192_s3, 4294967232  ;;  %s201_s21 = scalar_lea.sflag [#allocation6], %s820_s22  ;;  %s203_s27 = scalar_lea.vmem [#allocation5], %s820_s22 }
  0x5b   : > { %596 = dma.done.wait (%p907_p5), %s201_s21, 16  }
  0x5c   : > { %598 = vsyncadd (%p907_p5), %s201_s21, 4294967280  ;;  %s384_s8 = sshll.u32 %s621_s13, 1  ;;  %s227_s7 = scalar_lea.vmem [#allocation7], %s380_s26  ;;  %v228_v0 = vld [vmem:[%s195_s6] sm:$0xf] }
  0x5d   : > { %s252_s23 = sadd.s32 %s617_s12, %s384_s8  ;;  %s256_s17 = sshll.u32 %s227_s7, 4  ;;  %v382_v1 = vld [vmem:[%s203_s27] ss:$0 sm:$0xff]  ;;  %s836_s17 = int_to_ptr.vmem [resolvable:$true] %s256_s17 }
  0x5e   : > { %s385_s29 = sshll.u32 %s252_s23, 6  ;;  %v236_v2 = vmul.f32 %v382_v1, %v228_v0  ;;  %s239_s5 = scalar_lea.sflag [#allocation4], %s820_s22 }
  0x5f   : > { %s841_s24 = scalar_lea.hbm %s895_s2, %s385_s29  ;;  %s531_s13 = scalar_lea.vmem %s836_s17, 64 }
  0x60   : > { %237 = vst [vmem:[%s227_s7] sm:$0xf] %v236_v2  ;;  %p532_p8 = scmp.ne.s32.totalorder %s836_s17, %s531_s13  ;;  %p908_p0 = scmp.ne.s32.totalorder %s900_s25, 0 }
  0x61   : > { %s637_s12 = smov [#allocation7]  }
  0x62   : > { %p533_p7 = pnand %p532_p8, %p908_p0  ;;  %s535_s26 = sshll.u32 %s637_s12, 4  ;;  %s536_s26 = int_to_ptr.vmem [resolvable:$false] %s535_s26 }
  0x63   : > { %s537_s3 = scalar_lea.vmem %s536_s26, 128  ;;  %p538_p10 = scmp.lt.s32.totalorder %s836_s17, %s536_s26 }
  0x64   : > { %p534_p3 = pneg %p533_p7  ;;  %p539_p11 = scmp.lt.s32.totalorder %s537_s3, %s531_s13 }
  0x66   : > { %p540_p1 = por %p539_p11, %p538_p10 }
  0x68   : > { %p541_p2 = pnand %p540_p1, %p534_p3 }
  0x6a   : > { %544 = shalt.err (!%p541_p2)
}
  0x6b   : > { %s545_s22 = scalar_lea.hbm %s841_s24, 64  ;;  %s549_s27 = scalar_lea.hbm %s895_s2, 256 }
  0x6c   : > { %p546_p9 = scmp.ne.s32.totalorder %s841_s24, %s545_s22  ;;  %p550_p6 = scmp.lt.u32.totalorder %s841_s24, %s895_s2 }
  0x6d   : > { %p551_p13 = scmp.lt.u32.totalorder %s549_s27, %s545_s22  ;;  %p553_p8 = scmp.lt.u32.totalorder %s545_s22, %s841_s24 }
  0x6e   : > { %p547_p12 = pnand %p546_p9, %p908_p0 }
  0x6f   : > { %p552_p5 = por %p551_p13, %p550_p6 }
  0x70   : > { %p548_p4 = pneg %p547_p12 }
  0x71   : > { %p554_p7 = por %p553_p8, %p552_p5 }
  0x73   : > { %p555_p3 = pnand %p554_p7, %p548_p4 }
  0x75   : > { %558 = shalt.err (!%p555_p3)
}
  0x76   : > { %392 = dma.vmem_to_hbm [thread:$0]  (%p908_p0), %s836_s17, 64, %s841_s24, %s239_s5  }
  0x77 PF: > { %p406_p10 = scmp.ge.s32.totalorder %s633_s16, 2  ;;  %s268_s7 = sand.u32 1, %s605_s9  }
  0x78   : > { %p909_p11 = scmp.ne.s32.totalorder %s901_s28, 0  ;;  %s269_s29 = scalar_lea.sflag [#allocation4], %s268_s7 }
  0x7a   : > { %p402_p1 = pnand %p406_p10, %p909_p11 }
  0x7c   : > { %600 = dma.done.wait (!%p402_p1), %s269_s29, 64  }
  0x7d   : > { %602 = vsyncadd (!%p402_p1), %s269_s29, 4294967232  ;;  %s21_s16 = sadd.s32 1, %s633_s16   ;;  %s910_s9 = smov %s609_s10 }
  0x7e   : > { %p18_p2 = scmp.ge.s32.totalorder %s21_s16, 6   ;;  %s911_s10 = smov %s613_s11 }
  0x7f   : > { %s912_s11 = smov %s733_s30  ;;  %s913_s12 = smov %s625_s14 }
  0x80   : > { %s914_s13 = smov %s629_s15  ;;  %s915_s14 = smov %s918_s19 }
  0x81   : > { %s916_s15 = smov %s922_s20  ;;  %20 = sbr.rel (!%p18_p2) target bundleno = 9 (0x9), region = 86 }
  0x88   :  { %274 = vsyncpa [#allocation3], 1 }
  0x89   :  { %276 = vsyncpa [#allocation3 + $0x1], 1 }
  0x8a   :  { %277 = vsyncpa [#allocation6], 1 }
  0x8b   :  { %279 = vsyncpa [#allocation6 + $0x1], 1 }
  0x8c   :  { %280 = vsyncpa [#allocation4], 1 }
  0x8d   :  { %282 = vsyncpa [#allocation4 + $0x1], 1 }

</bundles_post_ra>
